<compile_context>
chip_gen: v6e
topology: v6e:2x2x1
jax: 0.10.0
libtpu: 0.0.40
codegen_flags: <defaults>
</compile_context>

<pallas_src>
import functools

import jax
import jax.numpy as jnp
from jax.experimental import pallas as pl
from jax.experimental.pallas import tpu as pltpu

_LANE = 128
_SUBLANE = 8
_BF16_ROW_PACK = 16            # bf16 packs 2 rows per sublane -> 16-row tiles
_MEGACORE_SPLIT_MIN_ROWS = 256  # only force >=2 grid steps above this batch


def _round_up(x, m):
    return ((x + m - 1) // m) * m


def qnetwork_kernel(x_ref, w1_ref, b1_ref, w2_ref, b2_ref, w3_ref, b3_ref,
                    o_ref):
    # fc1 + ReLU  (bf16 MXU matmul, f32 accumulation)
    h1 = jnp.dot(x_ref[...], w1_ref[...], preferred_element_type=jnp.float32)
    h1 = jnp.maximum(h1 + b1_ref[...], 0.0)
    # fc2 + ReLU  (w2 is zero-padded to 128 output lanes -> lane-dense h2)
    h2 = jnp.dot(h1.astype(w2_ref.dtype), w2_ref[...],
                 preferred_element_type=jnp.float32)
    h2 = jnp.maximum(h2 + b2_ref[...], 0.0)
    # fc2_drop: Dropout(p=0.4) is identity at inference time.
    # TODO(synk): training-mode dropout (pltpu.prng_seed + prng_random_bits
    # mask) is not wired in; this kernel is eval-only.
    # fc3 (no activation); w3/b3 are padded to a 128-lane slab, so the epilogue
    # is one dense unmasked (TILE_B, 128) store.
    out = jnp.dot(h2.astype(w3_ref.dtype), w3_ref[...],
                  preferred_element_type=jnp.float32)
    o_ref[...] = (out + b3_ref[...]).astype(o_ref.dtype)


def prepare_qnetwork_params(w1, b1, w2, b2, w3, b3,
                            compute_dtype=jnp.bfloat16):
    """One-time weight prep (call at load time, NOT per forward).

    wN are (in_features, out_features); bN are (1, out_features), all f32.
    Pads every hidden/output feature dim to 128 lanes, pads state_size to the
    bf16 sublane pack (16), and casts weights to compute_dtype. All padding is
    with zeros and is numerically exact for this network.
    """
    state_size, fc1_units = w1.shape
    fc2_units, action_size = w3.shape

    k1p = _round_up(state_size, _BF16_ROW_PACK)
    h1p = _round_up(fc1_units, _LANE)
    h2p = _round_up(fc2_units, _LANE)
    outp = _round_up(max(action_size, _LANE), _LANE)

    w1p = jnp.pad(w1, ((0, k1p - state_size), (0, h1p - fc1_units)))
    b1p = jnp.pad(b1, ((0, 0), (0, h1p - fc1_units)))
    w2p = jnp.pad(w2, ((0, h1p - fc1_units), (0, h2p - fc2_units)))
    b2p = jnp.pad(b2, ((0, 0), (0, h2p - fc2_units)))
    w3p = jnp.pad(w3, ((0, h2p - fc2_units), (0, outp - action_size)))
    b3p = jnp.pad(b3, ((0, 0), (0, outp - action_size)))

    return (w1p.astype(compute_dtype), b1p.astype(jnp.float32),
            w2p.astype(compute_dtype), b2p.astype(jnp.float32),
            w3p.astype(compute_dtype), b3p.astype(jnp.float32))


@functools.partial(jax.jit,
                   static_argnames=("action_size", "tile_b", "out_dtype"))
def qnetwork_forward(state, params, *, action_size, tile_b=1024,
                     out_dtype=jnp.float32):
    """state: (B, state_size) f32; params from prepare_qnetwork_params.

    Returns (B, action_size) in out_dtype. tile_b may be raised to 2048-4096
    for very large B (per-tile VMEM is only ~0.5-1 KiB/row).
    """
    w1p, b1p, w2p, b2p, w3p, b3p = params
    B, state_size = state.shape
    k1p, h1p = w1p.shape
    h2p, outp = w3p.shape
    compute_dtype = w1p.dtype

    # --- batch tiling --------------------------------------------------------
    # Round tiles to 16 rows (bf16 sublane pack). For large batches, cap the
    # tile so the grid has >=2 steps: with dimension_semantics=("parallel",)
    # that is what lets v7x's two TensorCores split the work.
    b_aligned = _round_up(B, _BF16_ROW_PACK)
    eff_tile_b = min(tile_b, b_aligned)
    if b_aligned >= _MEGACORE_SPLIT_MIN_ROWS:
        eff_tile_b = min(eff_tile_b,
                         _round_up(pl.cdiv(b_aligned, 2), _BF16_ROW_PACK))
    b_padded = _round_up(B, eff_tile_b)
    grid = (pl.cdiv(b_padded, eff_tile_b),)

    # --- activation cast + pad (the only per-call data prep) ----------------
    xp = jnp.pad(state.astype(compute_dtype),
                 ((0, b_padded - B), (0, k1p - state_size)))

    # Weights/biases stay resident in VMEM: constant block index -> no re-DMA.
    # (pl.Buffered(1) would halve their buffering, but at ~70 KiB total it is
    # not worth the compile-surface risk today.)
    resident = lambda shape: pl.BlockSpec(shape, lambda i: (0, 0))

    flops = 2 * b_padded * (k1p * h1p + h1p * h2p + h2p * outp)
    bytes_accessed = (xp.size * xp.dtype.itemsize
                      + w1p.size * 2 + w2p.size * 2 + w3p.size * 2
                      + b1p.size * 4 + b2p.size * 4 + b3p.size * 4
                      + b_padded * outp * jnp.dtype(out_dtype).itemsize)

    out = pl.pallas_call(
        qnetwork_kernel,
        out_shape=jax.ShapeDtypeStruct((b_padded, outp), out_dtype),
        grid=grid,
        in_specs=[
            pl.BlockSpec((eff_tile_b, k1p), lambda i: (i, 0)),  # x tile
            resident(w1p.shape), resident(b1p.shape),
            resident(w2p.shape), resident(b2p.shape),
            resident(w3p.shape), resident(b3p.shape),
        ],
        out_specs=pl.BlockSpec((eff_tile_b, outp), lambda i: (i, 0)),
        compiler_params=pltpu.CompilerParams(
            dimension_semantics=("parallel",),      # shards grid across TCs
            vmem_limit_bytes=32 * 1024 * 1024,      # v5e default is only 16 MiB
        ),
        cost_estimate=pl.CostEstimate(
            flops=flops, transcendentals=0, bytes_accessed=bytes_accessed),
    )(xp, w1p, b1p, w2p, b2p, w3p, b3p)

    # Slice padded batch rows / padded output lanes back off.
    # TODO(synk): for very large B with tiny action_size, benchmark a masked
    # narrow (tile_b, action_size) store against this padded slab + slice.
    return out[:B, :action_size]


def init_linear_params(key, in_features, out_features):
    """Deterministic init mimicking PyTorch nn.Linear default:
    U(-1/sqrt(fan_in), 1/sqrt(fan_in)). Weight returned as (in, out)."""
    kw, kb = jax.random.split(key)
    bound = 1.0 / jnp.sqrt(jnp.float32(in_features))
    w = jax.random.uniform(kw, (in_features, out_features), jnp.float32,
                           -bound, bound)
    b = jax.random.uniform(kb, (1, out_features), jnp.float32, -bound, bound)
    return w, b


def reference_forward(state, w1, b1, w2, b2, w3, b3,
                      compute_dtype=jnp.bfloat16):
    """Pure-JAX reference with the same bf16-input / f32-accumulate matmuls."""
    cd = compute_dtype
    h1 = jnp.maximum(
        jnp.dot(state.astype(cd), w1.astype(cd),
                preferred_element_type=jnp.float32) + b1, 0.0)
    h2 = jnp.maximum(
        jnp.dot(h1.astype(cd), w2.astype(cd),
                preferred_element_type=jnp.float32) + b2, 0.0)
    return jnp.dot(h2.astype(cd), w3.astype(cd),
                   preferred_element_type=jnp.float32) + b3


if __name__ == "__main__":
    # Small shapes consistent with the module.
    batch = 2
    state_size = 8
    action_size = 4
    fc1_units = 128
    fc2_units = 64

    key = jax.random.PRNGKey(0)
    k_state, k1, k2, k3 = jax.random.split(key, 4)

    state = jax.random.normal(k_state, (batch, state_size), jnp.float32)
    w1, b1 = init_linear_params(k1, state_size, fc1_units)
    w2, b2 = init_linear_params(k2, fc1_units, fc2_units)
    w3, b3 = init_linear_params(k3, fc2_units, action_size)

    # One-time weight prep (hoisted out of the per-call forward path).
    params = prepare_qnetwork_params(w1, b1, w2, b2, w3, b3)
    params = jax.block_until_ready(params)

    out = qnetwork_forward(state, params, action_size=action_size)
    out = jax.block_until_ready(out)

    ref = reference_forward(state, w1, b1, w2, b2, w3, b3)
    ref_f32 = jnp.maximum(jnp.maximum(state @ w1 + b1, 0.0) @ w2 + b2,
                          0.0) @ w3 + b3

    assert out.shape == (batch, action_size), out.shape
    # Tight check against a reference that uses identical bf16-input matmuls.
    assert jnp.allclose(out, ref, atol=1e-2, rtol=1e-2), (
        f"max err vs bf16 ref {jnp.max(jnp.abs(out - ref))}")
    # Looser sanity check against the pure-f32 math of the PyTorch module.
    assert jnp.allclose(out, ref_f32, atol=5e-2, rtol=5e-2), (
        f"max err vs f32 ref {jnp.max(jnp.abs(out - ref_f32))}")

    print("KERNEL_OK")
</pallas_src>

<mosaic_0001>
module attributes {stable_mosaic.version = 11 : i64} {
  func.func @qnetwork_kernel(%arg0: i32, %arg1: memref<16x16xbf16, #tpu.memory_space<vmem>>, %arg2: memref<16x128xbf16, #tpu.memory_space<vmem>>, %arg3: memref<1x128xf32, #tpu.memory_space<vmem>>, %arg4: memref<128x128xbf16, #tpu.memory_space<vmem>>, %arg5: memref<1x128xf32, #tpu.memory_space<vmem>>, %arg6: memref<128x128xbf16, #tpu.memory_space<vmem>>, %arg7: memref<1x128xf32, #tpu.memory_space<vmem>>, %arg8: memref<16x128xf32, #tpu.memory_space<vmem>>) attributes {dimension_semantics = [#tpu.dimension_semantics<parallel>], iteration_bounds = array<i64: 1>, scalar_prefetch = 0 : i64, scratch_operands = 0 : i64, tpu.core_type = #tpu.core_type<tc>, window_params = [{transform_indices = @transform_0, window_bounds = array<i64: 16, 16>}, {pipeline_mode = #tpu.pipeline_mode<synchronous>, transform_indices = @transform_1, window_bounds = array<i64: 16, 128>}, {pipeline_mode = #tpu.pipeline_mode<synchronous>, transform_indices = @transform_2, window_bounds = array<i64: 1, 128>}, {pipeline_mode = #tpu.pipeline_mode<synchronous>, transform_indices = @transform_3, window_bounds = array<i64: 128, 128>}, {pipeline_mode = #tpu.pipeline_mode<synchronous>, transform_indices = @transform_4, window_bounds = array<i64: 1, 128>}, {pipeline_mode = #tpu.pipeline_mode<synchronous>, transform_indices = @transform_5, window_bounds = array<i64: 128, 128>}, {pipeline_mode = #tpu.pipeline_mode<synchronous>, transform_indices = @transform_6, window_bounds = array<i64: 1, 128>}, {transform_indices = @transform_7, window_bounds = array<i64: 16, 128>}]} {
    %c0 = arith.constant 0 : index
    %c0_0 = arith.constant 0 : index
    %0 = vector.load %arg1[%c0, %c0_0] : memref<16x16xbf16, #tpu.memory_space<vmem>>, vector<16x16xbf16>
    %c0_1 = arith.constant 0 : index
    %c0_2 = arith.constant 0 : index
    %1 = vector.load %arg2[%c0_1, %c0_2] : memref<16x128xbf16, #tpu.memory_space<vmem>>, vector<16x128xbf16>
    %cst = arith.constant dense<0.000000e+00> : vector<16x128xf32>
    %2 = tpu.matmul %0, %1, %cst {dimension_numbers = #tpu.dot_dimension_numbers<[1], [0], [0], [1], [0, 0, 1, 1], [], []>} : vector<16x16xbf16>, vector<16x128xbf16>, vector<16x128xf32> -> vector<16x128xf32>
    %c0_3 = arith.constant 0 : index
    %c0_4 = arith.constant 0 : index
    %3 = vector.load %arg3[%c0_3, %c0_4] : memref<1x128xf32, #tpu.memory_space<vmem>>, vector<1x128xf32>
    %4 = vector.broadcast %3 : vector<1x128xf32> to vector<16x128xf32>
    %5 = arith.addf %2, %4 : vector<16x128xf32>
    %cst_5 = arith.constant 0.000000e+00 : f32
    %6 = vector.broadcast %cst_5 : f32 to vector<16x128xf32>
    %7 = arith.maximumf %5, %6 : vector<16x128xf32>
    %8 = arith.truncf %7 : vector<16x128xf32> to vector<16x128xbf16>
    %c0_6 = arith.constant 0 : index
    %c0_7 = arith.constant 0 : index
    %9 = vector.load %arg4[%c0_6, %c0_7] : memref<128x128xbf16, #tpu.memory_space<vmem>>, vector<128x128xbf16>
    %cst_8 = arith.constant dense<0.000000e+00> : vector<16x128xf32>
    %10 = tpu.matmul %8, %9, %cst_8 {dimension_numbers = #tpu.dot_dimension_numbers<[1], [0], [0], [1], [0, 0, 1, 1], [], []>} : vector<16x128xbf16>, vector<128x128xbf16>, vector<16x128xf32> -> vector<16x128xf32>
    %c0_9 = arith.constant 0 : index
    %c0_10 = arith.constant 0 : index
    %11 = vector.load %arg5[%c0_9, %c0_10] : memref<1x128xf32, #tpu.memory_space<vmem>>, vector<1x128xf32>
    %12 = vector.broadcast %11 : vector<1x128xf32> to vector<16x128xf32>
    %13 = arith.addf %10, %12 : vector<16x128xf32>
    %cst_11 = arith.constant 0.000000e+00 : f32
    %14 = vector.broadcast %cst_11 : f32 to vector<16x128xf32>
    %15 = arith.maximumf %13, %14 : vector<16x128xf32>
    %16 = arith.truncf %15 : vector<16x128xf32> to vector<16x128xbf16>
    %c0_12 = arith.constant 0 : index
    %c0_13 = arith.constant 0 : index
    %17 = vector.load %arg6[%c0_12, %c0_13] : memref<128x128xbf16, #tpu.memory_space<vmem>>, vector<128x128xbf16>
    %cst_14 = arith.constant dense<0.000000e+00> : vector<16x128xf32>
    %18 = tpu.matmul %16, %17, %cst_14 {dimension_numbers = #tpu.dot_dimension_numbers<[1], [0], [0], [1], [0, 0, 1, 1], [], []>} : vector<16x128xbf16>, vector<128x128xbf16>, vector<16x128xf32> -> vector<16x128xf32>
    %c0_15 = arith.constant 0 : index
    %c0_16 = arith.constant 0 : index
    %19 = vector.load %arg7[%c0_15, %c0_16] : memref<1x128xf32, #tpu.memory_space<vmem>>, vector<1x128xf32>
    %20 = vector.broadcast %19 : vector<1x128xf32> to vector<16x128xf32>
    %21 = arith.addf %18, %20 : vector<16x128xf32>
    %c0_17 = arith.constant 0 : index
    %c0_18 = arith.constant 0 : index
    %22 = vector.load %arg8[%c0_17, %c0_18] : memref<16x128xf32, #tpu.memory_space<vmem>>, vector<16x128xf32>
    tpu.vector_store %arg8[%c0_17, %c0_18], %21 {strides = array<i32>} : memref<16x128xf32, #tpu.memory_space<vmem>>, vector<16x128xf32>,
    return
  }
  func.func @transform_0(%arg0: i32) -> (i32, i32) {
    %c0_i32 = arith.constant 0 : i32
    %c0_i32_0 = arith.constant 0 : i32
    return %arg0, %c0_i32 : i32, i32
  }
  func.func @transform_1(%arg0: i32) -> (i32, i32) {
    %c0_i32 = arith.constant 0 : i32
    %c0_i32_0 = arith.constant 0 : i32
    %c0_i32_1 = arith.constant 0 : i32
    return %c0_i32, %c0_i32_0 : i32, i32
  }
  func.func @transform_2(%arg0: i32) -> (i32, i32) {
    %c0_i32 = arith.constant 0 : i32
    %c0_i32_0 = arith.constant 0 : i32
    %c0_i32_1 = arith.constant 0 : i32
    return %c0_i32, %c0_i32_0 : i32, i32
  }
  func.func @transform_3(%arg0: i32) -> (i32, i32) {
    %c0_i32 = arith.constant 0 : i32
    %c0_i32_0 = arith.constant 0 : i32
    %c0_i32_1 = arith.constant 0 : i32
    return %c0_i32, %c0_i32_0 : i32, i32
  }
  func.func @transform_4(%arg0: i32) -> (i32, i32) {
    %c0_i32 = arith.constant 0 : i32
    %c0_i32_0 = arith.constant 0 : i32
    %c0_i32_1 = arith.constant 0 : i32
    return %c0_i32, %c0_i32_0 : i32, i32
  }
  func.func @transform_5(%arg0: i32) -> (i32, i32) {
    %c0_i32 = arith.constant 0 : i32
    %c0_i32_0 = arith.constant 0 : i32
    %c0_i32_1 = arith.constant 0 : i32
    return %c0_i32, %c0_i32_0 : i32, i32
  }
  func.func @transform_6(%arg0: i32) -> (i32, i32) {
    %c0_i32 = arith.constant 0 : i32
    %c0_i32_0 = arith.constant 0 : i32
    %c0_i32_1 = arith.constant 0 : i32
    return %c0_i32, %c0_i32_0 : i32, i32
  }
  func.func @transform_7(%arg0: i32) -> (i32, i32) {
    %c0_i32 = arith.constant 0 : i32
    %c0_i32_0 = arith.constant 0 : i32
    return %arg0, %c0_i32 : i32, i32
  }
}

</mosaic_0001>

<bundles_post_ra>
// kernel: qnetwork_forward.1
= control target key start
LH: loop header
LB: loop body
LE: loop exit
PB: predicated region body
PF: predicated region fallthrough
CT: control target
= control target key end

     0   :  { %12 = vsyncpa [#allocation3], 0  ;;  %s609_s0 = inlined_call_operand.vmem [shape: bf16[16,16], index: 0, kind: input, shape index: {}]   ;;  %s610_s1 = inlined_call_operand.vmem [shape: bf16[16,128], index: 1, kind: input, shape index: {}]   ;;  %s611_s2 = inlined_call_operand.vmem [shape: f32[1,128], index: 2, kind: input, shape index: {}]   ;;  %s612_s3 = inlined_call_operand.hbm [shape: bf16[128,128], index: 3, kind: input, shape index: {}]   ;;  %s613_s4 = inlined_call_operand.vmem [shape: f32[1,128], index: 4, kind: input, shape index: {}]   ;;  %s614_s5 = inlined_call_operand.hbm [shape: bf16[128,128], index: 5, kind: input, shape index: {}]   ;;  %s615_s6 = inlined_call_operand.vmem [shape: f32[1,128], index: 6, kind: input, shape index: {}]   ;;  %s616_s7 = inlined_call_operand.vmem [shape: f32[16,128], index: 7, kind: output, shape index: {}]  }
   0x1   :  { %13 = vsyncpa [#allocation5], 0  ;;  %s516_s24 = smov [#allocation2]  }
   0x2   :  { %s25_s25 = sshll.u32 %s516_s24, 4  ;;  %s26_s25 = int_to_ptr.vmem [resolvable:$true] %s25_s25 }
   0x3   :  { %s480_s26 = scalar_lea.vmem %s26_s25, 1024  ;;  %p485_p1 = scmp.lt.s32.totalorder %s26_s25, %s26_s25 }
   0x4   :  { %p481_p0 = scmp.ne.s32.totalorder %s26_s25, %s480_s26  ;;  %p486_p2 = scmp.lt.s32.totalorder %s480_s26, %s480_s26 }
   0x6   :  { %p487_p3 = por %p486_p2, %p485_p1 }
   0x8   :  { %p488_p4 = pnand %p487_p3, %p481_p0 }
   0xa   :  { %491 = shalt.err (!%p488_p4)
}
   0xb   :  { %s517_s27 = smov 64   ;;  %s518_s28 = smov 4  }
   0xc   :  { %31 = dma.hbm_to_vmem [thread:$0]  %s612_s3, 1024, %s26_s25, [#allocation3], %s517_s27, %s517_s27, %s518_s28  }
   0xd   :  { %s519_s8 = smov [#allocation4]  }
   0xe   :  { %s39_s9 = sshll.u32 %s519_s8, 4  ;;  %s40_s9 = int_to_ptr.vmem [resolvable:$true] %s39_s9 }
   0xf   :  { %s500_s10 = scalar_lea.vmem %s40_s9, 1024  ;;  %p505_p6 = scmp.lt.s32.totalorder %s40_s9, %s40_s9 }
  0x10   :  { %p501_p5 = scmp.ne.s32.totalorder %s40_s9, %s500_s10  ;;  %p506_p7 = scmp.lt.s32.totalorder %s500_s10, %s500_s10 }
  0x12   :  { %p507_p8 = por %p506_p7, %p505_p6 }
  0x14   :  { %p508_p9 = pnand %p507_p8, %p501_p5 }
  0x16   :  { %511 = shalt.err (!%p508_p9)
}
  0x17   :  { %45 = dma.hbm_to_vmem [thread:$0]  %s614_s5, 1024, %s40_s9, [#allocation5], %s517_s27, %s517_s27, %s518_s28  }
  0x18   :  { %512 = dma.done.wait [#allocation3], 1024  }
  0x19   :  { %513 = vsyncadd [#allocation3], 4294966272 }
  0x1a   :  { %514 = dma.done.wait [#allocation5], 1024  }
  0x1b   :  { %515 = vsyncadd [#allocation5], 4294966272  ;;  %v520_v0 = vmov 0.0   ;;  %vm521_vm0 = vmmov 0   ;;  %v454_v1 = vld [vmem:[%s610_s1] sm:$0xff]   ;;  %vm77_vm1 = vcmask 130048  }
  0x1c   :  { %402 = vmatprep.subr.bf16.mxu0 %v520_v0  ;;  %404 = vmatprep.mubr.msk.bf16.mxu0 %vm521_vm0, %v520_v0  ;;  %v455_v2 = vld [vmem:[%s609_s0] sm:$0xff]   ;;  %v456_v3 = vld [vmem:[#allocation2 + $0x38] sm:$0xff]   ;;  %v457_v4 = vld [vmem:[#allocation2 + $0x30] sm:$0xff]  }
  0x1d   :  { %408 = vmatprep.subr.bf16.mxu1 %v520_v0  ;;  %424 = vmatprep.mubr.msk.bf16.mxu1 %vm521_vm0, %v520_v0  ;;  %v458_v5 = vld [vmem:[#allocation2 + $0x28] sm:$0xff]   ;;  %v459_v6 = vld [vmem:[#allocation2 + $0x20] sm:$0xff]   ;;  %v460_v7 = vld [vmem:[#allocation2 + $0x18] sm:$0xff]  }
  0x1e   :  { %403 = vmatpush3.bf16.msra.mxu0 %v454_v1  ;;  %409 = vmatpush3.bf16.msra.mxu1 %v456_v3  ;;  %v461_v8 = vld [vmem:[#allocation2 + $0x10] sm:$0xff]   ;;  %v462_v9 = vld [vmem:[#allocation2 + $0x8] sm:$0xff]   ;;  %v463_v10 = vld [vmem:[#allocation2] sm:$0xff]  }
  0x1f   :  { %428 = vmatprep.subr.bf16.mxu0 %v520_v0  ;;  %410 = vmatprep.subr.bf16.mxu1 %v520_v0  ;;  %v464_v11 = vld [vmem:[#allocation4 + $0x38] sm:$0xff]   ;;  %v465_v12 = vld [vmem:[#allocation4 + $0x30] sm:$0xff]   ;;  %v466_v13 = vld [vmem:[#allocation4 + $0x28] sm:$0xff]  }
  0x20   :  { %v467_v14 = vld [vmem:[#allocation4 + $0x20] sm:$0xff]   ;;  %v468_v15 = vld [vmem:[#allocation4 + $0x18] sm:$0xff]   ;;  %v469_v26 = vld [vmem:[#allocation4 + $0x10] sm:$0xff]  }
  0x21   :  { %405 = vmatmul.mubr.msk.bf16.vlgmr.msra.gmra.mxu0 %vm77_vm1, %v455_v2  ;;  %v360_v16 = vld [vmem:[%s611_s2] ss:$0 sm:$0xff]  ;;  %v470_v27 = vld [vmem:[#allocation4 + $0x8] sm:$0xff]  }
  0x22   :  { %444 = vmatprep.mubr.msk.bf16.mxu0 %vm521_vm0, %v520_v0  ;;  %411 = vmatpush3.bf16.msra.mxu1 %v457_v4  ;;  %v471_v28 = vld [vmem:[#allocation4] sm:$0xff]  }
  0x23   :  { %412 = vmatprep.subr.bf16.mxu1 %v520_v0  ;;  %429 = vmatpush3.bf16.msra.mxu0 %v464_v11  ;;  %v364_v29 = vld [vmem:[%s613_s4] ss:$0 sm:$0xff] }
  0x24   :  { %430 = vmatprep.subr.bf16.mxu0 %v520_v0  ;;  %v373_v39 = vld [vmem:[%s615_s6] ss:$0 sm:$0xff] }
  0x26   :  { %413 = vmatpush3.bf16.msra.mxu1 %v458_v5 }
  0x27   :  { %414 = vmatprep.subr.bf16.mxu1 %v520_v0  ;;  %431 = vmatpush3.bf16.msra.mxu0 %v465_v12 }
  0x28   :  { %432 = vmatprep.subr.bf16.mxu0 %v520_v0 }
  0x2a   :  { %415 = vmatpush3.bf16.msra.mxu1 %v459_v6 }
  0x2b   :  { %416 = vmatprep.subr.bf16.mxu1 %v520_v0  ;;  %433 = vmatpush3.bf16.msra.mxu0 %v466_v13 }
  0x2c   :  { %434 = vmatprep.subr.bf16.mxu0 %v520_v0 }
  0x2e   :  { %417 = vmatpush3.bf16.msra.mxu1 %v460_v7 }
  0x2f   :  { %418 = vmatprep.subr.bf16.mxu1 %v520_v0  ;;  %435 = vmatpush3.bf16.msra.mxu0 %v467_v14 }
  0x30   :  { %436 = vmatprep.subr.bf16.mxu0 %v520_v0 }
  0x32   :  { %419 = vmatpush3.bf16.msra.mxu1 %v461_v8 }
  0x33   :  { %420 = vmatprep.subr.bf16.mxu1 %v520_v0  ;;  %437 = vmatpush3.bf16.msra.mxu0 %v468_v15 }
  0x34   :  { %438 = vmatprep.subr.bf16.mxu0 %v520_v0 }
  0x36   :  { %421 = vmatpush3.bf16.msra.mxu1 %v462_v9 }
  0x37   :  { %422 = vmatprep.subr.bf16.mxu1 %v520_v0  ;;  %439 = vmatpush3.bf16.msra.mxu0 %v469_v26 }
  0x38   :  { %440 = vmatprep.subr.bf16.mxu0 %v520_v0 }
  0x3a   :  { %423 = vmatpush3.bf16.msra.mxu1 %v463_v10 }
  0x3b   :  { %441 = vmatpush3.bf16.msra.mxu0 %v470_v27 }
  0x3c   :  { %442 = vmatprep.subr.bf16.mxu0 %v520_v0 }
  0x3f   :  { %443 = vmatpush3.bf16.msra.mxu0 %v471_v28 }
  0xe1   :  { %v115_v17 = vpop.f32.mrf.mxu0 }
  0xe2   :  { %v116_v19 = vadd.f32 %v360_v16, %v115_v17 }
  0xe3   :  { %v406_v18 = vpop.f32.mrf.mxu0 }
  0xe4   :  { %v122_v23 = vmax.f32 %v116_v19, 0.0 }
  0xe5   :  { %v118_v20 = vpop.f32.mrf.mxu0 }
  0xe6   :  { %v119_v21 = vadd.f32 %v360_v16, %v118_v20 }
  0xe7   :  { %v407_v22 = vpop.f32.mrf.mxu0 }
  0xe8   :  { %v123_v24 = vmax.f32 %v119_v21, 0.0 }
  0xea   :  { %v124_v25 = vpack.c.bf16 %v123_v24, %v122_v23 }
  0xec   :  { %425 = vmatmul.mubr.bf16.vlgmr.msra.gmra.mxu1 %v124_v25 }
 0x1ac   :  { %v230_v30 = vpop.f32.mrf.mxu1 }
 0x1ad   :  { %v231_v32 = vadd.f32 %v364_v29, %v230_v30 }
 0x1ae   :  { %v426_v31 = vpop.f32.mrf.mxu1 }
 0x1af   :  { %v237_v36 = vmax.f32 %v231_v32, 0.0 }
 0x1b0   :  { %v233_v33 = vpop.f32.mrf.mxu1 }
 0x1b1   :  { %v234_v34 = vadd.f32 %v364_v29, %v233_v33 }
 0x1b2   :  { %v427_v35 = vpop.f32.mrf.mxu1 }
 0x1b3   :  { %v238_v37 = vmax.f32 %v234_v34, 0.0 }
 0x1b5   :  { %v239_v38 = vpack.c.bf16 %v238_v37, %v237_v36 }
 0x1b7   :  { %445 = vmatmul.mubr.bf16.vlgmr.msra.gmra.mxu0 %v239_v38 }
 0x277   :  { %v345_v40 = vpop.f32.mrf.mxu0 }
 0x278   :  { %v346_v41 = vadd.f32 %v373_v39, %v345_v40 }
 0x279   :  { %v446_v42 = vpop.f32.mrf.mxu0 }
 0x27a   :  { %352 = vst [vmem:[%s616_s7] sm:$0xff] %v346_v41 }
 0x27b   :  { %v348_v43 = vpop.f32.mrf.mxu0 }
 0x27c   :  { %v349_v44 = vadd.f32 %v373_v39, %v348_v43 }
 0x27d   :  { %v447_v45 = vpop.f32.mrf.mxu0 }
 0x27e   :  { %353 = vst [vmem:[%s616_s7 + $0x8] sm:$0xff] %v349_v44 }
 0x27f   :  { %358 = vsyncpa [#allocation3], 1 }
 0x280   :  { %359 = vsyncpa [#allocation5], 1 }

</bundles_post_ra>
